<compile_context>
chip_gen: v7x
topology: tpu7x:2x2x1
jax: 0.10.0
libtpu: 0.0.40
codegen_flags: <defaults>
</compile_context>

<pallas_src>
import jax
import jax.numpy as jnp
import numpy as np
from jax.experimental import pallas as pl
from jax.experimental.pallas import tpu as pltpu

_LANE = 128      # points per row (lane axis)
_MAX_TM = 2048   # max rows of 128 points per grid step (2 MiB / coord block)

# ---------------------------------------------------------------------------
# In-kernel fast trig.  Flame coordinates are bounded after the affine map,
# so a 2-term Cody-Waite reduction mod pi plus short Taylor polynomials on
# [-pi/2, pi/2] is accurate to ~3e-6 (sin) / ~2.5e-5 (cos) absolute, far
# below the test tolerance, at a fraction of the VALU cost of jnp.sin/cos.
# ---------------------------------------------------------------------------
_PI_HI = 3.140625             # 9-bit-mantissa high part of pi (k*_PI_HI exact)
_PI_LO = 9.6765358979e-4      # pi - _PI_HI
_INV_PI = 0.3183098861837907  # 1/pi


def _range_reduce_pi(x):
    """x -> (r, sign) with x = k*pi + r, r in [-pi/2, pi/2], sign = (-1)^k."""
    k = jnp.floor(x * _INV_PI + 0.5)
    r = x - k * _PI_HI
    r = r - k * _PI_LO
    parity = k - 2.0 * jnp.floor(k * 0.5)     # 0.0 or 1.0
    sign = 1.0 - 2.0 * parity                 # +1.0 or -1.0
    return r, sign


def _sin_poly(r):
    """sin(r) for r in [-pi/2, pi/2] (Taylor through r^9, err ~3.6e-6)."""
    r2 = r * r
    return r * (1.0 + r2 * (-1.0 / 6.0 + r2 * (1.0 / 120.0
               + r2 * (-1.0 / 5040.0 + r2 * (1.0 / 362880.0)))))


def _cos_poly(r):
    """cos(r) for r in [-pi/2, pi/2] (Taylor through r^8, err ~2.5e-5)."""
    r2 = r * r
    return 1.0 + r2 * (-0.5 + r2 * (1.0 / 24.0
             + r2 * (-1.0 / 720.0 + r2 * (1.0 / 40320.0))))


def _fast_sin(x):
    r, s = _range_reduce_pi(x)
    return s * _sin_poly(r)


def _fast_sincos(x):
    # Shared range reduction for sin and cos of the same argument.
    r, s = _range_reduce_pi(x)
    return s * _sin_poly(r), s * _cos_poly(r)


# ---------------------------------------------------------------------------
# Kernel
# ---------------------------------------------------------------------------
def _function_kernel(affine_ref, weights_ref, pts_ref, out_ref):
    # pts_ref / out_ref: (2, TM, 128) VMEM blocks; plane 0 = x, plane 1 = y.
    # affine_ref: (6,) SMEM; weights_ref: (4,) SMEM.
    x = pts_ref[0]            # (TM, 128) dense tile
    y = pts_ref[1]

    # --- SimpleTransform: affine map (scalar reads hoisted, once per block) ---
    a = affine_ref[0]
    b = affine_ref[1]
    c = affine_ref[2]
    d = affine_ref[3]
    e = affine_ref[4]
    f = affine_ref[5]
    tx = a * x + b * y + c
    ty = d * x + e * y + f

    # --- VariationSet: weighted sum of variations ---
    r2 = tx * tx + ty * ty
    inv_r2 = 1.0 / (r2 + 1e-9)            # exact reciprocal (matches reference)

    sin_r2, cos_r2 = _fast_sincos(r2)     # one shared range reduction
    sin_tx = _fast_sin(tx)
    sin_ty = _fast_sin(ty)

    w_lin = weights_ref[0]
    w_sin = weights_ref[1]
    w_sph = weights_ref[2]
    w_swl = weights_ref[3]

    # NOTE: for sparse variation sets one could gate the sinusoidal/swirl
    # branches on their scalar weight with pl.when + a VMEM accumulator; all
    # weights are non-zero here so the unconditional form is kept.
    ox = (w_lin * tx
          + w_sin * sin_tx
          + w_sph * tx * inv_r2
          + w_swl * (tx * sin_r2 - ty * cos_r2))
    oy = (w_lin * ty
          + w_sin * sin_ty
          + w_sph * ty * inv_r2
          + w_swl * (tx * cos_r2 + ty * sin_r2))

    # Two dense full-tile plane stores (no jnp.stack concat intermediate).
    out_ref[0] = ox
    out_ref[1] = oy


# ---------------------------------------------------------------------------
# Wrapper / tiling
# ---------------------------------------------------------------------------
def _pick_tm(rows_needed):
    """Power-of-two row block <= _MAX_TM, shrunk so the grid has >= 2 steps
    whenever the input is big enough (keeps both v7x TensorCores busy)."""
    tm = _MAX_TM
    while tm > 8 and 2 * tm > rows_needed:
        tm //= 2
    return tm


def flame_function_planar(pts_planar, affine, weights, *, tm):
    """pts_planar: (2, R, 128) f32 planar points -> (2, R, 128) f32 output."""
    _, rows, lane = pts_planar.shape
    assert lane == _LANE and rows % tm == 0
    n = rows * lane
    cost = pl.CostEstimate(flops=90 * n, transcendentals=n,
                           bytes_accessed=16 * n)
    return pl.pallas_call(
        _function_kernel,
        out_shape=jax.ShapeDtypeStruct((2, rows, lane), jnp.float32),
        grid=(rows // tm,),
        in_specs=[
            pl.BlockSpec(memory_space=pltpu.MemorySpace.SMEM),   # affine (6,)
            pl.BlockSpec(memory_space=pltpu.MemorySpace.SMEM),   # weights (4,)
            pl.BlockSpec((2, tm, _LANE), lambda i: (0, i, 0)),   # point block
        ],
        out_specs=pl.BlockSpec((2, tm, _LANE), lambda i: (0, i, 0)),
        compiler_params=pltpu.CompilerParams(
            dimension_semantics=("parallel",)),                  # megacore on v7x
        cost_estimate=cost,
    )(affine.astype(jnp.float32), weights.astype(jnp.float32),
      pts_planar.astype(jnp.float32))


def _to_planar(points_n2, tm):
    """(N, 2) -> ((2, rows, 128), N) with rows a multiple of tm (zero pad)."""
    n = points_n2.shape[0]
    rows_needed = max(-(-n // _LANE), 1)
    rows = -(-rows_needed // tm) * tm
    pad = rows * _LANE - n
    if pad:
        points_n2 = jnp.pad(points_n2, ((0, pad), (0, 0)))
    planar = jnp.moveaxis(points_n2.reshape(rows, _LANE, 2), -1, 0)
    return planar, n


def _from_planar(planar, n):
    rows, lane = planar.shape[1], planar.shape[2]
    out = jnp.moveaxis(planar, 0, -1).reshape(rows * lane, 2)
    return out[:n]


def flame_function(points_n2, affine, weights):
    """PyTorch-compatible entry: points (N, 2) f32 -> (N, 2) f32.

    In a real flame iteration loop, keep the planar form across iterations
    (call flame_function_planar directly) so the layout permutes only happen
    once at the loop boundary.
    """
    n = points_n2.shape[0]
    rows_needed = max(-(-n // _LANE), 1)
    tm = _pick_tm(rows_needed)
    planar, n = _to_planar(points_n2.astype(jnp.float32), tm)
    out_planar = flame_function_planar(planar, affine, weights, tm=tm)
    return _from_planar(out_planar, n)


# ---------------------------------------------------------------------------
# Reference + self-test
# ---------------------------------------------------------------------------
def _reference(points_n2, affine, weights):
    x = points_n2[:, 0]
    y = points_n2[:, 1]
    a, b, c, d, e, f = [affine[i] for i in range(6)]
    tx = a * x + b * y + c
    ty = d * x + e * y + f
    r2 = tx * tx + ty * ty
    inv_r2 = 1.0 / (r2 + 1e-9)
    sr2, cr2 = jnp.sin(r2), jnp.cos(r2)
    w0, w1, w2, w3 = [weights[i] for i in range(4)]
    ox = w0 * tx + w1 * jnp.sin(tx) + w2 * tx * inv_r2 + w3 * (tx * sr2 - ty * cr2)
    oy = w0 * ty + w1 * jnp.sin(ty) + w2 * ty * inv_r2 + w3 * (tx * cr2 + ty * sr2)
    return jnp.stack([ox, oy], axis=-1)


if __name__ == "__main__":
    key = jax.random.PRNGKey(0)

    # Deterministic "parameters" (SimpleTransform affine + VariationSet weights).
    affine = jnp.asarray(np.array([0.80, -0.30, 0.10,
                                   0.25, 0.90, -0.05], dtype=np.float32))
    weights = jnp.asarray(np.array([0.4, 0.3, 0.2, 0.1], dtype=np.float32))

    # 256: block == full-array path; 1000: padding / odd-N path;
    # 4096: multi-step grid path.
    for n_points in (256, 1000, 128 * 32):
        k, key = jax.random.split(key)
        points = jax.random.normal(k, (n_points, 2), dtype=jnp.float32)

        out = flame_function(points, affine, weights)
        out = jax.block_until_ready(out)

        ref = _reference(points, affine, weights)
        # Tolerance accounts for the polynomial sin/cos (<~3e-5 abs error).
        np.testing.assert_allclose(np.asarray(out), np.asarray(ref),
                                   rtol=2e-3, atol=2e-3)

    print("KERNEL_OK")
</pallas_src>

<mosaic_0001>
module attributes {stable_mosaic.version = 11 : i64} {
  func.func @_function_kernel(%arg0: i32, %arg1: memref<6xf32, #tpu.memory_space<smem>>, %arg2: memref<4xf32, #tpu.memory_space<smem>>, %arg3: memref<2x8x128xf32, #tpu.memory_space<vmem>>, %arg4: memref<2x8x128xf32, #tpu.memory_space<vmem>>) attributes {dimension_semantics = [#tpu.dimension_semantics<parallel>], iteration_bounds = array<i64: 1>, scalar_prefetch = 0 : i64, scratch_operands = 0 : i64, tpu.core_type = #tpu.core_type<tc>, window_params = [{transform_indices = @transform_0, window_bounds = array<i64: 6>}, {transform_indices = @transform_1, window_bounds = array<i64: 4>}, {transform_indices = @transform_2, window_bounds = array<i64: 2, 8, 128>}, {transform_indices = @transform_3, window_bounds = array<i64: 2, 8, 128>}]} {
    %c0 = arith.constant 0 : index
    %c0_0 = arith.constant 0 : index
    %c0_1 = arith.constant 0 : index
    %0 = vector.load %arg3[%c0, %c0_0, %c0_1] : memref<2x8x128xf32, #tpu.memory_space<vmem>>, vector<1x8x128xf32>
    %1 = vector.shape_cast %0 : vector<1x8x128xf32> to vector<8x128xf32>
    %c1 = arith.constant 1 : index
    %c0_2 = arith.constant 0 : index
    %c0_3 = arith.constant 0 : index
    %2 = vector.load %arg3[%c1, %c0_2, %c0_3] : memref<2x8x128xf32, #tpu.memory_space<vmem>>, vector<1x8x128xf32>
    %3 = vector.shape_cast %2 : vector<1x8x128xf32> to vector<8x128xf32>
    %c0_4 = arith.constant 0 : index
    %4 = memref.load %arg1[%c0_4] : memref<6xf32, #tpu.memory_space<smem>>
    %c1_5 = arith.constant 1 : index
    %5 = memref.load %arg1[%c1_5] : memref<6xf32, #tpu.memory_space<smem>>
    %c2 = arith.constant 2 : index
    %6 = memref.load %arg1[%c2] : memref<6xf32, #tpu.memory_space<smem>>
    %c3 = arith.constant 3 : index
    %7 = memref.load %arg1[%c3] : memref<6xf32, #tpu.memory_space<smem>>
    %c4 = arith.constant 4 : index
    %8 = memref.load %arg1[%c4] : memref<6xf32, #tpu.memory_space<smem>>
    %c5 = arith.constant 5 : index
    %9 = memref.load %arg1[%c5] : memref<6xf32, #tpu.memory_space<smem>>
    %10 = vector.broadcast %4 : f32 to vector<8x128xf32>
    %11 = arith.mulf %10, %1 : vector<8x128xf32>
    %12 = vector.broadcast %5 : f32 to vector<8x128xf32>
    %13 = arith.mulf %12, %3 : vector<8x128xf32>
    %14 = arith.addf %11, %13 : vector<8x128xf32>
    %15 = vector.broadcast %6 : f32 to vector<8x128xf32>
    %16 = arith.addf %14, %15 : vector<8x128xf32>
    %17 = vector.broadcast %7 : f32 to vector<8x128xf32>
    %18 = arith.mulf %17, %1 : vector<8x128xf32>
    %19 = vector.broadcast %8 : f32 to vector<8x128xf32>
    %20 = arith.mulf %19, %3 : vector<8x128xf32>
    %21 = arith.addf %18, %20 : vector<8x128xf32>
    %22 = vector.broadcast %9 : f32 to vector<8x128xf32>
    %23 = arith.addf %21, %22 : vector<8x128xf32>
    %24 = arith.mulf %16, %16 : vector<8x128xf32>
    %25 = arith.mulf %23, %23 : vector<8x128xf32>
    %26 = arith.addf %24, %25 : vector<8x128xf32>
    %cst = arith.constant 9.99999971E-10 : f32
    %27 = vector.broadcast %cst : f32 to vector<8x128xf32>
    %28 = arith.addf %26, %27 : vector<8x128xf32>
    %cst_6 = arith.constant 1.000000e+00 : f32
    %29 = vector.broadcast %cst_6 : f32 to vector<8x128xf32>
    %30 = arith.divf %29, %28 : vector<8x128xf32>
    %cst_7 = arith.constant 0.318309873 : f32
    %31 = vector.broadcast %cst_7 : f32 to vector<8x128xf32>
    %32 = arith.mulf %26, %31 : vector<8x128xf32>
    %cst_8 = arith.constant 5.000000e-01 : f32
    %33 = vector.broadcast %cst_8 : f32 to vector<8x128xf32>
    %34 = arith.addf %32, %33 : vector<8x128xf32>
    %35 = math.floor %34 : vector<8x128xf32>
    %cst_9 = arith.constant 3.140625 : f32
    %36 = vector.broadcast %cst_9 : f32 to vector<8x128xf32>
    %37 = arith.mulf %35, %36 : vector<8x128xf32>
    %38 = arith.subf %26, %37 : vector<8x128xf32>
    %cst_10 = arith.constant 9.67653584E-4 : f32
    %39 = vector.broadcast %cst_10 : f32 to vector<8x128xf32>
    %40 = arith.mulf %35, %39 : vector<8x128xf32>
    %41 = arith.subf %38, %40 : vector<8x128xf32>
    %cst_11 = arith.constant 5.000000e-01 : f32
    %42 = vector.broadcast %cst_11 : f32 to vector<8x128xf32>
    %43 = arith.mulf %35, %42 : vector<8x128xf32>
    %44 = math.floor %43 : vector<8x128xf32>
    %cst_12 = arith.constant 2.000000e+00 : f32
    %45 = vector.broadcast %cst_12 : f32 to vector<8x128xf32>
    %46 = arith.mulf %45, %44 : vector<8x128xf32>
    %47 = arith.subf %35, %46 : vector<8x128xf32>
    %cst_13 = arith.constant 2.000000e+00 : f32
    %48 = vector.broadcast %cst_13 : f32 to vector<8x128xf32>
    %49 = arith.mulf %48, %47 : vector<8x128xf32>
    %cst_14 = arith.constant 1.000000e+00 : f32
    %50 = vector.broadcast %cst_14 : f32 to vector<8x128xf32>
    %51 = arith.subf %50, %49 : vector<8x128xf32>
    %52 = arith.mulf %41, %41 : vector<8x128xf32>
    %cst_15 = arith.constant 2.75573188E-6 : f32
    %53 = vector.broadcast %cst_15 : f32 to vector<8x128xf32>
    %54 = arith.mulf %52, %53 : vector<8x128xf32>
    %cst_16 = arith.constant -1.98412701E-4 : f32
    %55 = vector.broadcast %cst_16 : f32 to vector<8x128xf32>
    %56 = arith.addf %55, %54 : vector<8x128xf32>
    %57 = arith.mulf %52, %56 : vector<8x128xf32>
    %cst_17 = arith.constant 0.00833333377 : f32
    %58 = vector.broadcast %cst_17 : f32 to vector<8x128xf32>
    %59 = arith.addf %58, %57 : vector<8x128xf32>
    %60 = arith.mulf %52, %59 : vector<8x128xf32>
    %cst_18 = arith.constant -0.166666672 : f32
    %61 = vector.broadcast %cst_18 : f32 to vector<8x128xf32>
    %62 = arith.addf %61, %60 : vector<8x128xf32>
    %63 = arith.mulf %52, %62 : vector<8x128xf32>
    %cst_19 = arith.constant 1.000000e+00 : f32
    %64 = vector.broadcast %cst_19 : f32 to vector<8x128xf32>
    %65 = arith.addf %64, %63 : vector<8x128xf32>
    %66 = arith.mulf %41, %65 : vector<8x128xf32>
    %67 = arith.mulf %51, %66 : vector<8x128xf32>
    %68 = arith.mulf %41, %41 : vector<8x128xf32>
    %cst_20 = arith.constant 2.48015876E-5 : f32
    %69 = vector.broadcast %cst_20 : f32 to vector<8x128xf32>
    %70 = arith.mulf %68, %69 : vector<8x128xf32>
    %cst_21 = arith.constant -0.00138888892 : f32
    %71 = vector.broadcast %cst_21 : f32 to vector<8x128xf32>
    %72 = arith.addf %71, %70 : vector<8x128xf32>
    %73 = arith.mulf %68, %72 : vector<8x128xf32>
    %cst_22 = arith.constant 0.0416666679 : f32
    %74 = vector.broadcast %cst_22 : f32 to vector<8x128xf32>
    %75 = arith.addf %74, %73 : vector<8x128xf32>
    %76 = arith.mulf %68, %75 : vector<8x128xf32>
    %cst_23 = arith.constant -5.000000e-01 : f32
    %77 = vector.broadcast %cst_23 : f32 to vector<8x128xf32>
    %78 = arith.addf %77, %76 : vector<8x128xf32>
    %79 = arith.mulf %68, %78 : vector<8x128xf32>
    %cst_24 = arith.constant 1.000000e+00 : f32
    %80 = vector.broadcast %cst_24 : f32 to vector<8x128xf32>
    %81 = arith.addf %80, %79 : vector<8x128xf32>
    %82 = arith.mulf %51, %81 : vector<8x128xf32>
    %cst_25 = arith.constant 0.318309873 : f32
    %83 = vector.broadcast %cst_25 : f32 to vector<8x128xf32>
    %84 = arith.mulf %16, %83 : vector<8x128xf32>
    %cst_26 = arith.constant 5.000000e-01 : f32
    %85 = vector.broadcast %cst_26 : f32 to vector<8x128xf32>
    %86 = arith.addf %84, %85 : vector<8x128xf32>
    %87 = math.floor %86 : vector<8x128xf32>
    %cst_27 = arith.constant 3.140625 : f32
    %88 = vector.broadcast %cst_27 : f32 to vector<8x128xf32>
    %89 = arith.mulf %87, %88 : vector<8x128xf32>
    %90 = arith.subf %16, %89 : vector<8x128xf32>
    %cst_28 = arith.constant 9.67653584E-4 : f32
    %91 = vector.broadcast %cst_28 : f32 to vector<8x128xf32>
    %92 = arith.mulf %87, %91 : vector<8x128xf32>
    %93 = arith.subf %90, %92 : vector<8x128xf32>
    %cst_29 = arith.constant 5.000000e-01 : f32
    %94 = vector.broadcast %cst_29 : f32 to vector<8x128xf32>
    %95 = arith.mulf %87, %94 : vector<8x128xf32>
    %96 = math.floor %95 : vector<8x128xf32>
    %cst_30 = arith.constant 2.000000e+00 : f32
    %97 = vector.broadcast %cst_30 : f32 to vector<8x128xf32>
    %98 = arith.mulf %97, %96 : vector<8x128xf32>
    %99 = arith.subf %87, %98 : vector<8x128xf32>
    %cst_31 = arith.constant 2.000000e+00 : f32
    %100 = vector.broadcast %cst_31 : f32 to vector<8x128xf32>
    %101 = arith.mulf %100, %99 : vector<8x128xf32>
    %cst_32 = arith.constant 1.000000e+00 : f32
    %102 = vector.broadcast %cst_32 : f32 to vector<8x128xf32>
    %103 = arith.subf %102, %101 : vector<8x128xf32>
    %104 = arith.mulf %93, %93 : vector<8x128xf32>
    %cst_33 = arith.constant 2.75573188E-6 : f32
    %105 = vector.broadcast %cst_33 : f32 to vector<8x128xf32>
    %106 = arith.mulf %104, %105 : vector<8x128xf32>
    %cst_34 = arith.constant -1.98412701E-4 : f32
    %107 = vector.broadcast %cst_34 : f32 to vector<8x128xf32>
    %108 = arith.addf %107, %106 : vector<8x128xf32>
    %109 = arith.mulf %104, %108 : vector<8x128xf32>
    %cst_35 = arith.constant 0.00833333377 : f32
    %110 = vector.broadcast %cst_35 : f32 to vector<8x128xf32>
    %111 = arith.addf %110, %109 : vector<8x128xf32>
    %112 = arith.mulf %104, %111 : vector<8x128xf32>
    %cst_36 = arith.constant -0.166666672 : f32
    %113 = vector.broadcast %cst_36 : f32 to vector<8x128xf32>
    %114 = arith.addf %113, %112 : vector<8x128xf32>
    %115 = arith.mulf %104, %114 : vector<8x128xf32>
    %cst_37 = arith.constant 1.000000e+00 : f32
    %116 = vector.broadcast %cst_37 : f32 to vector<8x128xf32>
    %117 = arith.addf %116, %115 : vector<8x128xf32>
    %118 = arith.mulf %93, %117 : vector<8x128xf32>
    %119 = arith.mulf %103, %118 : vector<8x128xf32>
    %cst_38 = arith.constant 0.318309873 : f32
    %120 = vector.broadcast %cst_38 : f32 to vector<8x128xf32>
    %121 = arith.mulf %23, %120 : vector<8x128xf32>
    %cst_39 = arith.constant 5.000000e-01 : f32
    %122 = vector.broadcast %cst_39 : f32 to vector<8x128xf32>
    %123 = arith.addf %121, %122 : vector<8x128xf32>
    %124 = math.floor %123 : vector<8x128xf32>
    %cst_40 = arith.constant 3.140625 : f32
    %125 = vector.broadcast %cst_40 : f32 to vector<8x128xf32>
    %126 = arith.mulf %124, %125 : vector<8x128xf32>
    %127 = arith.subf %23, %126 : vector<8x128xf32>
    %cst_41 = arith.constant 9.67653584E-4 : f32
    %128 = vector.broadcast %cst_41 : f32 to vector<8x128xf32>
    %129 = arith.mulf %124, %128 : vector<8x128xf32>
    %130 = arith.subf %127, %129 : vector<8x128xf32>
    %cst_42 = arith.constant 5.000000e-01 : f32
    %131 = vector.broadcast %cst_42 : f32 to vector<8x128xf32>
    %132 = arith.mulf %124, %131 : vector<8x128xf32>
    %133 = math.floor %132 : vector<8x128xf32>
    %cst_43 = arith.constant 2.000000e+00 : f32
    %134 = vector.broadcast %cst_43 : f32 to vector<8x128xf32>
    %135 = arith.mulf %134, %133 : vector<8x128xf32>
    %136 = arith.subf %124, %135 : vector<8x128xf32>
    %cst_44 = arith.constant 2.000000e+00 : f32
    %137 = vector.broadcast %cst_44 : f32 to vector<8x128xf32>
    %138 = arith.mulf %137, %136 : vector<8x128xf32>
    %cst_45 = arith.constant 1.000000e+00 : f32
    %139 = vector.broadcast %cst_45 : f32 to vector<8x128xf32>
    %140 = arith.subf %139, %138 : vector<8x128xf32>
    %141 = arith.mulf %130, %130 : vector<8x128xf32>
    %cst_46 = arith.constant 2.75573188E-6 : f32
    %142 = vector.broadcast %cst_46 : f32 to vector<8x128xf32>
    %143 = arith.mulf %141, %142 : vector<8x128xf32>
    %cst_47 = arith.constant -1.98412701E-4 : f32
    %144 = vector.broadcast %cst_47 : f32 to vector<8x128xf32>
    %145 = arith.addf %144, %143 : vector<8x128xf32>
    %146 = arith.mulf %141, %145 : vector<8x128xf32>
    %cst_48 = arith.constant 0.00833333377 : f32
    %147 = vector.broadcast %cst_48 : f32 to vector<8x128xf32>
    %148 = arith.addf %147, %146 : vector<8x128xf32>
    %149 = arith.mulf %141, %148 : vector<8x128xf32>
    %cst_49 = arith.constant -0.166666672 : f32
    %150 = vector.broadcast %cst_49 : f32 to vector<8x128xf32>
    %151 = arith.addf %150, %149 : vector<8x128xf32>
    %152 = arith.mulf %141, %151 : vector<8x128xf32>
    %cst_50 = arith.constant 1.000000e+00 : f32
    %153 = vector.broadcast %cst_50 : f32 to vector<8x128xf32>
    %154 = arith.addf %153, %152 : vector<8x128xf32>
    %155 = arith.mulf %130, %154 : vector<8x128xf32>
    %156 = arith.mulf %140, %155 : vector<8x128xf32>
    %c0_51 = arith.constant 0 : index
    %157 = memref.load %arg2[%c0_51] : memref<4xf32, #tpu.memory_space<smem>>
    %c1_52 = arith.constant 1 : index
    %158 = memref.load %arg2[%c1_52] : memref<4xf32, #tpu.memory_space<smem>>
    %c2_53 = arith.constant 2 : index
    %159 = memref.load %arg2[%c2_53] : memref<4xf32, #tpu.memory_space<smem>>
    %c3_54 = arith.constant 3 : index
    %160 = memref.load %arg2[%c3_54] : memref<4xf32, #tpu.memory_space<smem>>
    %161 = vector.broadcast %157 : f32 to vector<8x128xf32>
    %162 = arith.mulf %161, %16 : vector<8x128xf32>
    %163 = vector.broadcast %158 : f32 to vector<8x128xf32>
    %164 = arith.mulf %163, %119 : vector<8x128xf32>
    %165 = arith.addf %162, %164 : vector<8x128xf32>
    %166 = vector.broadcast %159 : f32 to vector<8x128xf32>
    %167 = arith.mulf %166, %16 : vector<8x128xf32>
    %168 = arith.mulf %167, %30 : vector<8x128xf32>
    %169 = arith.addf %165, %168 : vector<8x128xf32>
    %170 = arith.mulf %16, %67 : vector<8x128xf32>
    %171 = arith.mulf %23, %82 : vector<8x128xf32>
    %172 = arith.subf %170, %171 : vector<8x128xf32>
    %173 = vector.broadcast %160 : f32 to vector<8x128xf32>
    %174 = arith.mulf %173, %172 : vector<8x128xf32>
    %175 = arith.addf %169, %174 : vector<8x128xf32>
    %176 = vector.broadcast %157 : f32 to vector<8x128xf32>
    %177 = arith.mulf %176, %23 : vector<8x128xf32>
    %178 = vector.broadcast %158 : f32 to vector<8x128xf32>
    %179 = arith.mulf %178, %156 : vector<8x128xf32>
    %180 = arith.addf %177, %179 : vector<8x128xf32>
    %181 = vector.broadcast %159 : f32 to vector<8x128xf32>
    %182 = arith.mulf %181, %23 : vector<8x128xf32>
    %183 = arith.mulf %182, %30 : vector<8x128xf32>
    %184 = arith.addf %180, %183 : vector<8x128xf32>
    %185 = arith.mulf %16, %82 : vector<8x128xf32>
    %186 = arith.mulf %23, %67 : vector<8x128xf32>
    %187 = arith.addf %185, %186 : vector<8x128xf32>
    %188 = vector.broadcast %160 : f32 to vector<8x128xf32>
    %189 = arith.mulf %188, %187 : vector<8x128xf32>
    %190 = arith.addf %184, %189 : vector<8x128xf32>
    %c0_55 = arith.constant 0 : index
    %c0_56 = arith.constant 0 : index
    %c0_57 = arith.constant 0 : index
    %191 = vector.load %arg4[%c0_55, %c0_56, %c0_57] : memref<2x8x128xf32, #tpu.memory_space<vmem>>, vector<1x8x128xf32>
    %192 = vector.shape_cast %191 : vector<1x8x128xf32> to vector<8x128xf32>
    %193 = vector.shape_cast %175 : vector<8x128xf32> to vector<1x8x128xf32>
    tpu.vector_store %arg4[%c0_55, %c0_56, %c0_57], %193 {strides = array<i32>} : memref<2x8x128xf32, #tpu.memory_space<vmem>>, vector<1x8x128xf32>,
    %c1_58 = arith.constant 1 : index
    %c0_59 = arith.constant 0 : index
    %c0_60 = arith.constant 0 : index
    %194 = vector.load %arg4[%c1_58, %c0_59, %c0_60] : memref<2x8x128xf32, #tpu.memory_space<vmem>>, vector<1x8x128xf32>
    %195 = vector.shape_cast %194 : vector<1x8x128xf32> to vector<8x128xf32>
    %196 = vector.shape_cast %190 : vector<8x128xf32> to vector<1x8x128xf32>
    tpu.vector_store %arg4[%c1_58, %c0_59, %c0_60], %196 {strides = array<i32>} : memref<2x8x128xf32, #tpu.memory_space<vmem>>, vector<1x8x128xf32>,
    return
  }
  func.func @transform_0(%arg0: i32) -> i32 {
    %c0_i32 = arith.constant 0 : i32
    %c0_i32_0 = arith.constant 0 : i32
    return %c0_i32 : i32
  }
  func.func @transform_1(%arg0: i32) -> i32 {
    %c0_i32 = arith.constant 0 : i32
    %c0_i32_0 = arith.constant 0 : i32
    return %c0_i32 : i32
  }
  func.func @transform_2(%arg0: i32) -> (i32, i32, i32) {
    %c0_i32 = arith.constant 0 : i32
    %c0_i32_0 = arith.constant 0 : i32
    %c0_i32_1 = arith.constant 0 : i32
    return %c0_i32, %arg0, %c0_i32_0 : i32, i32, i32
  }
  func.func @transform_3(%arg0: i32) -> (i32, i32, i32) {
    %c0_i32 = arith.constant 0 : i32
    %c0_i32_0 = arith.constant 0 : i32
    %c0_i32_1 = arith.constant 0 : i32
    return %c0_i32, %arg0, %c0_i32_0 : i32, i32, i32
  }
}

</mosaic_0001>

<bundles_post_ra>
// kernel: tpu_custom_call.1
= control target key start
LH: loop header
LB: loop body
LE: loop exit
PB: predicated region body
PF: predicated region fallthrough
CT: control target
= control target key end

     0   :  { %8 = vsyncpa [#allocation5], 0  ;;  %s412_s0 = inlined_call_operand.hbm [shape: f32[6], index: 0, kind: input, shape index: {}]   ;;  %s413_s1 = inlined_call_operand.vmem [shape: f32[4], index: 1, kind: input, shape index: {}]   ;;  %s414_s2 = inlined_call_operand.hbm [shape: f32[2,8,128], index: 2, kind: input, shape index: {}]   ;;  %s415_s3 = inlined_call_operand.hbm [shape: f32[2,8,128], index: 3, kind: output, shape index: {}]  }
   0x1   :  { %9 = vsyncpa [#allocation6], 0 }
   0x2   :  { %10 = vsyncpa [#allocation3], 0 }
   0x3   :  { %11 = vsyncpa [#allocation4], 0  ;;  %s26_s14 = sshll.u32 %s413_s1, 4  ;;  %s230_s17 = scalar_lea.hbm %s412_s0, 16  ;;  %s27_s14 = int_to_ptr.vmem [resolvable:$true] %s26_s14 }
   0x4   :  { %p231_p0 = scmp.ne.s32.totalorder %s412_s0, %s230_s17  ;;  %p234_p1 = scmp.lt.u32.totalorder %s230_s17, %s412_s0 }
   0x6   :  { %p236_p2 = pnand %p234_p1, %p231_p0 }
   0x8   :  { %239 = shalt.err (!%p236_p2)
}
   0x9   :  { %s304_s22 = smov [#allocation2]   ;;  %s240_s1 = scalar_lea.vmem %s27_s14, 16 }
   0xa   :  { %19 = dma.hbm_to_smem %s412_s0, 16, %s304_s22, [#allocation5]  }
   0xb   :  { %p241_p3 = scmp.ne.s32.totalorder %s27_s14, %s240_s1  ;;  %p245_p4 = scmp.lt.s32.totalorder %s27_s14, %s27_s14 }
   0xc   :  { %p246_p5 = scmp.lt.s32.totalorder %s240_s1, %s240_s1 }
   0xe   :  { %p247_p6 = por %p246_p5, %p245_p4 }
  0x10   :  { %p248_p7 = pnand %p247_p6, %p241_p3 }
  0x12   :  { %251 = shalt.err (!%p248_p7)
}
  0x13   :  { %s305_s25 = smov [#allocation7]   ;;  %s306_s26 = smov [#allocation8]  }
  0x14   :  { %29 = dma.vmem_to_smem %s27_s14, 16, %s305_s25, [#allocation6]  }
  0x15   :  { %s35_s27 = sshll.u32 %s306_s26, 4  ;;  %s252_s30 = scalar_lea.hbm %s414_s2, 256  ;;  %s36_s27 = int_to_ptr.vmem [resolvable:$true] %s35_s27 }
  0x16   :  { %p253_p8 = scmp.ne.s32.totalorder %s414_s2, %s252_s30  ;;  %p256_p9 = scmp.lt.u32.totalorder %s252_s30, %s414_s2 }
  0x18   :  { %p258_p10 = pnand %p256_p9, %p253_p8 }
  0x1a   :  { %261 = shalt.err (!%p258_p10)
}
  0x1b   :  { %s262_s7 = scalar_lea.vmem %s36_s27, 256  ;;  %p267_p12 = scmp.lt.s32.totalorder %s36_s27, %s36_s27 }
  0x1c   :  { %p263_p11 = scmp.ne.s32.totalorder %s36_s27, %s262_s7  ;;  %p268_p13 = scmp.lt.s32.totalorder %s262_s7, %s262_s7 }
  0x1e   :  { %p269_p0 = por %p268_p13, %p267_p12 }
  0x20   :  { %p270_p1 = pnand %p269_p0, %p263_p11 }
  0x22   :  { %273 = shalt.err (!%p270_p1)
}
  0x23   :  { %s307_s8 = smov 128   ;;  %s308_s9 = smov 8  }
  0x24   :  { %41 = dma.hbm_to_vmem [thread:$0]  %s414_s2, 256, %s36_s27, [#allocation3], %s307_s8, %s307_s8, %s308_s9  }
  0x25   :  { %296 = dma.done.wait [#allocation5], 16  }
  0x26   :  { %297 = vsyncadd [#allocation5], 4294967280 }
  0x27   :  { %298 = dma.done.wait [#allocation6], 16  }
  0x28   :  { %299 = vsyncadd [#allocation6], 4294967280 }
  0x29   :  { %300 = dma.done.wait [#allocation3], 256  }
  0x2a   :  { %301 = vsyncadd [#allocation3], 4294967040 }
  0x2b   :  { %51 = sfence }
  0x2c   :  { %s55_s12 = sld [smem:[#allocation2]]  ;;  %s214_s13 = sld [smem:[#allocation2 + $0x1]]  ;;  %v52_v0 = vld [vmem:[#allocation8] sm:$0xff]  ;;  %v54_v1 = vld [vmem:[#allocation8 + $0x8] sm:$0xff] }
  0x2d   :  { %s215_s14 = sld [smem:[#allocation2 + $0x2]]  ;;  %s216_s15 = sld [smem:[#allocation2 + $0x3]] }
  0x2e   :  { %s217_s16 = sld [smem:[#allocation2 + $0x4]]  ;;  %s218_s17 = sld [smem:[#allocation2 + $0x5]] }
  0x2f   :  { %s376_s2 = sld [smem:[#allocation7 + $0x2]]  ;;  %s378_s18 = sld [smem:[#allocation7]] }
  0x30   :  { %s380_s19 = sld [smem:[#allocation7 + $0x1]]  ;;  %s385_s20 = sld [smem:[#allocation7 + $0x3]] }
  0x31   :  { %s309_s21 = smov [#allocation9]  }
  0x32   :  { %v61_v2 = vstv %s55_s12  ;;  %v63_v3 = vstv %s214_s13  ;;  %s200_s22 = sshll.u32 %s309_s21, 4  ;;  %s201_s22 = int_to_ptr.vmem [resolvable:$true] %s200_s22 }
  0x33   :  { %v62_v4 = vmul.f32 %v61_v2, %v52_v0  ;;  %v64_v5 = vmul.f32 %v63_v3, %v54_v1  ;;  %v68_v6 = vstv %s216_s15  ;;  %v66_v7 = vstv %s215_s14  ;;  %s274_s23 = scalar_lea.vmem %s201_s22, 256  ;;  %p279_p3 = scmp.lt.s32.totalorder %s201_s22, %s201_s22 }
  0x34   :  { %v69_v8 = vmul.f32 %v68_v6, %v52_v0  ;;  %v70_v9 = vstv %s217_s16  ;;  %v73_v12 = vstv %s218_s17  ;;  %p275_p2 = scmp.ne.s32.totalorder %s201_s22, %s274_s23  ;;  %p280_p4 = scmp.lt.s32.totalorder %s274_s23, %s274_s23 }
  0x35   :  { %v65_v10 = vadd.f32 %v64_v5, %v62_v4  ;;  %v71_v11 = vmul.f32 %v70_v9, %v54_v1 }
  0x36   :  { %p281_p5 = por %p280_p4, %p279_p3 }
  0x37   :  { %v360_v13 = vadd.f32 %v66_v7, %v65_v10  ;;  %v72_v14 = vadd.f32 %v71_v11, %v69_v8 }
  0x38   :  { %p282_p6 = pnand %p281_p5, %p275_p2 }
  0x39   :  { %v362_v15 = vadd.f32 %v73_v12, %v72_v14  ;;  %v75_v16 = vmul.f32 %v360_v13, %v360_v13  ;;  %v114_v17 = vmul.f32 0.31830987, %v360_v13 }
  0x3b   :  { %v76_v18 = vmul.f32 %v362_v15, %v362_v15  ;;  %v115_v19 = vadd.f32 0.5, %v114_v17  ;;  %v138_v20 = vmul.f32 0.31830987, %v362_v15 }
  0x3d   :  { %v77_v21 = vadd.f32 %v76_v18, %v75_v16  ;;  %v116_v22 = vfloor.f32 %v115_v19  ;;  %v139_v23 = vadd.f32 0.5, %v138_v20 }
  0x3f   :  { %v81_v24 = vmul.f32 0.31830987, %v77_v21  ;;  %v117_v25 = vmul.f32 3.140625, %v116_v22  ;;  %v119_v26 = vmul.f32 0.0009676536, %v116_v22  ;;  %v140_v27 = vfloor.f32 %v139_v23 }
  0x40   :  { %v121_v30 = vmul.f32 0.5, %v116_v22  ;;  %v78_v53 = vadd.f32 1e-09, %v77_v21 }
  0x41   :  { %v82_v28 = vadd.f32 0.5, %v81_v24  ;;  %v118_v29 = vsub.f32 %v360_v13, %v117_v25  ;;  %v141_v31 = vmul.f32 3.140625, %v140_v27  ;;  %v143_v32 = vmul.f32 0.0009676536, %v140_v27 }
  0x42   :  { %v145_v36 = vmul.f32 0.5, %v140_v27  ;;  %v122_v40 = vfloor.f32 %v121_v30  ;;  %228 = vrcp.f32 %v78_v53  ;;  %v171_v25 = vstv %s376_s2 }
  0x43   :  { %v83_v33 = vfloor.f32 %v82_v28  ;;  %v120_v34 = vsub.f32 %v118_v29, %v119_v26  ;;  %v142_v35 = vsub.f32 %v362_v15, %v141_v31 }
  0x44   :  { %v146_v45 = vfloor.f32 %v145_v36  ;;  %v123_v49 = vmul.f32 2.0, %v122_v40  ;;  %v172_v36 = vmul.f32 %v171_v25, %v360_v13 }
  0x45   :  { %v84_v37 = vmul.f32 3.140625, %v83_v33  ;;  %v86_v38 = vmul.f32 0.0009676536, %v83_v33  ;;  %v88_v39 = vmul.f32 0.5, %v83_v33  ;;  %v127_v41 = vmul.f32 %v120_v34, %v120_v34 }
  0x46   :  { %v144_v42 = vsub.f32 %v142_v35, %v143_v32  ;;  %v147_v55 = vmul.f32 2.0, %v146_v45  ;;  %v124_v60 = vsub.f32 %v116_v22, %v123_v49 }
  0x47   :  { %v85_v43 = vsub.f32 %v77_v21, %v84_v37  ;;  %v128_v44 = vmul.f32 2.7557319e-06, %v127_v41  ;;  %v89_v48 = vfloor.f32 %v88_v39 }
  0x48   :  { %v151_v46 = vmul.f32 %v144_v42, %v144_v42  ;;  %v148_v2 = vsub.f32 %v140_v27, %v147_v55  ;;  %v125_v7 = vmul.f32 2.0, %v124_v60  ;;  %v166_v27 = vstv %s378_s18 }
  0x49   :  { %v372_v47 = vsub.f32 %v85_v43, %v86_v38  ;;  %v129_v50 = vadd.f32 -0.0001984127, %v128_v44  ;;  %v90_v57 = vmul.f32 2.0, %v89_v48  ;;  %v184_v38 = vmul.f32 %v171_v25, %v362_v15 }
  0x4a   :  { %v152_v51 = vmul.f32 2.7557319e-06, %v151_v46  ;;  %v149_v14 = vmul.f32 2.0, %v148_v2  ;;  %v126_v20 = vsub.f32 1.0, %v125_v7  ;;  %v181_v45 = vmul.f32 %v166_v27, %v362_v15 }
  0x4b   :  { %v94_v52 = vmul.f32 %v372_v47, %v372_v47  ;;  %v130_v54 = vmul.f32 %v129_v50, %v127_v41  ;;  %v91_v4 = vsub.f32 %v83_v33, %v90_v57  ;;  %v168_v33 = vstv %s380_s19 }
  0x4c   :  { %v153_v56 = vadd.f32 -0.0001984127, %v152_v51  ;;  %v150_v28 = vsub.f32 1.0, %v149_v14  ;;  %v229_v39 = vpop.eup %228 }
  0x4d   :  { %v95_v58 = vmul.f32 2.7557319e-06, %v94_v52  ;;  %v105_v59 = vmul.f32 2.4801588e-05, %v94_v52  ;;  %v131_v61 = vadd.f32 0.008333334, %v130_v54  ;;  %v173_v49 = vmul.f32 %v229_v39, %v172_v36 }
  0x4e   :  { %v154_v62 = vmul.f32 %v153_v56, %v151_v46  ;;  %v92_v17 = vmul.f32 2.0, %v91_v4  ;;  %v185_v51 = vmul.f32 %v229_v39, %v184_v38 }
  0x4f   :  { %v96_v63 = vadd.f32 -0.0001984127, %v95_v58  ;;  %v106_v0 = vadd.f32 -0.0013888889, %v105_v59  ;;  %v132_v1 = vmul.f32 %v131_v61, %v127_v41  ;;  %v178_v58 = vstv %s385_s20 }
  0x50   :  { %v155_v3 = vadd.f32 0.008333334, %v154_v62  ;;  %v93_v30 = vsub.f32 1.0, %v92_v17 }
  0x51   :  { %v97_v5 = vmul.f32 %v96_v63, %v94_v52  ;;  %v107_v6 = vmul.f32 %v106_v0, %v94_v52  ;;  %v133_v8 = vadd.f32 -0.16666667, %v132_v1 }
  0x52   :  { %v156_v9 = vmul.f32 %v155_v3, %v151_v46 }
  0x53   :  { %v98_v10 = vadd.f32 0.008333334, %v97_v5  ;;  %v108_v11 = vadd.f32 0.041666668, %v107_v6  ;;  %v134_v12 = vmul.f32 %v133_v8, %v127_v41 }
  0x54   :  { %v157_v16 = vadd.f32 -0.16666667, %v156_v9 }
  0x55   :  { %v99_v18 = vmul.f32 %v98_v10, %v94_v52  ;;  %v109_v19 = vmul.f32 %v108_v11, %v94_v52  ;;  %v135_v21 = vadd.f32 1.0, %v134_v12 }
  0x56   :  { %v158_v22 = vmul.f32 %v157_v16, %v151_v46 }
  0x57   :  { %v100_v23 = vadd.f32 -0.16666667, %v99_v18  ;;  %v110_v24 = vadd.f32 -0.5, %v109_v19  ;;  %v136_v26 = vmul.f32 %v135_v21, %v120_v34  ;;  %v167_v34 = vmul.f32 %v166_v27, %v360_v13 }
  0x58   :  { %v159_v29 = vadd.f32 1.0, %v158_v22 }
  0x59   :  { %v101_v31 = vmul.f32 %v100_v23, %v94_v52  ;;  %v111_v32 = vmul.f32 %v110_v24, %v94_v52  ;;  %v137_v35 = vmul.f32 %v136_v26, %v126_v20 }
  0x5a   :  { %v160_v37 = vmul.f32 %v159_v29, %v144_v42 }
  0x5b   :  { %v102_v40 = vadd.f32 1.0, %v101_v31  ;;  %v112_v41 = vadd.f32 1.0, %v111_v32  ;;  %v169_v43 = vmul.f32 %v168_v33, %v137_v35 }
  0x5c   :  { %v161_v44 = vmul.f32 %v160_v37, %v150_v28 }
  0x5d   :  { %v103_v46 = vmul.f32 %v102_v40, %v372_v47  ;;  %v113_v48 = vmul.f32 %v112_v41, %v93_v30  ;;  %v170_v42 = vadd.f32 %v169_v43, %v167_v34 }
  0x5e   :  { %v182_v50 = vmul.f32 %v168_v33, %v161_v44 }
  0x5f   :  { %v104_v52 = vmul.f32 %v103_v46, %v93_v30  ;;  %v176_v53 = vmul.f32 %v113_v48, %v362_v15  ;;  %v187_v54 = vmul.f32 %v113_v48, %v360_v13  ;;  %v174_v59 = vadd.f32 %v173_v49, %v170_v42 }
  0x60   :  { %v183_v55 = vadd.f32 %v182_v50, %v181_v45 }
  0x61   :  { %v175_v56 = vmul.f32 %v104_v52, %v360_v13  ;;  %v188_v57 = vmul.f32 %v104_v52, %v362_v15 }
  0x62   :  { %v186_v61 = vadd.f32 %v185_v51, %v183_v55 }
  0x63   :  { %v177_v60 = vsub.f32 %v175_v56, %v176_v53  ;;  %v189_v47 = vadd.f32 %v188_v57, %v187_v54 }
  0x65   :  { %v179_v62 = vmul.f32 %v178_v58, %v177_v60  ;;  %v190_v63 = vmul.f32 %v189_v47, %v178_v58 }
  0x67   :  { %v180_v0 = vadd.f32 %v179_v62, %v174_v59  ;;  %v191_v1 = vadd.f32 %v190_v63, %v186_v61 }
  0x69   :  { %192 = vst [vmem:[#allocation9] sm:$0xff] %v180_v0  ;;  %194 = vst [vmem:[#allocation9 + $0x8] sm:$0xff] %v191_v1 }
  0x6a   :  { %285 = shalt.err (!%p282_p6)
}
  0x6b   :  { %s286_s25 = scalar_lea.hbm %s415_s3, 256 }
  0x6c   :  { %p287_p7 = scmp.ne.s32.totalorder %s415_s3, %s286_s25  ;;  %p290_p8 = scmp.lt.u32.totalorder %s286_s25, %s415_s3 }
  0x6e   :  { %p292_p9 = pnand %p290_p8, %p287_p7 }
  0x70   :  { %295 = shalt.err (!%p292_p9)
}
  0x71   :  { %206 = dma.vmem_to_hbm [thread:$0]  %s201_s22, 256, %s415_s3, [#allocation4], %s307_s8, %s307_s8, %s308_s9  }
  0x72   :  { %302 = dma.done.wait [#allocation4], 256  }
  0x73   :  { %303 = vsyncadd [#allocation4], 4294967040 }
  0x74   :  { %210 = vsyncpa [#allocation3], 1 }
  0x75   :  { %211 = vsyncpa [#allocation4], 1 }
  0x76   :  { %212 = vsyncpa [#allocation5], 1 }
  0x77   :  { %213 = vsyncpa [#allocation6], 1 }

</bundles_post_ra>
